<compile_context>
chip_gen: v7x
topology: tpu7x:2x2x1
jax: 0.10.0
libtpu: 0.0.40
codegen_flags: <defaults>
</compile_context>

<pallas_src>
import numpy as np
import jax
import jax.numpy as jnp
from jax.experimental import pallas as pl
from jax.experimental.pallas import tpu as pltpu

BN_EPS = 1e-5


# ----------------------------- Pallas kernel -----------------------------

def _attn_gate_kernel(g_ref, s_ref, w1g_ref, w1s_ref, b1_ref, w2_ref, b2_ref,
                      o_ref):
    # Channel-major tiles: channels on sublanes, spatial on lanes.
    #   g_ref : (1, Cg, TM) f32      w1g_ref: (Ci, Cg) bf16 (BN-folded, transposed)
    #   s_ref : (1, Cs, TM) f32      w1s_ref: (Ci, Cs) bf16 (BN-folded, transposed)
    #   b1_ref: (Ci, 1) f32          w2_ref : (Ci, Ci) bf16 (transposed)
    #   b2_ref: (Ci, 1) f32          o_ref  : (1, Cs, TM) f32
    g = g_ref[0]                                   # (Cg, TM)
    s = s_ref[0]                                   # (Cs, TM)

    # Gate body: MXU matmuls with bf16 operands, f32 accumulation.
    h = jnp.dot(w1g_ref[...], g.astype(jnp.bfloat16),
                preferred_element_type=jnp.float32)
    h = h + jnp.dot(w1s_ref[...], s.astype(jnp.bfloat16),
                    preferred_element_type=jnp.float32)
    h = jnp.maximum(h + b1_ref[...], 0.0)          # folded BN biases + ReLU

    logits = jnp.dot(w2_ref[...], h.astype(jnp.bfloat16),
                     preferred_element_type=jnp.float32) + b2_ref[...]

    # Numerically stable sigmoid on the EUP (tanh) — no exp overflow path.
    att = 0.5 * (jnp.tanh(0.5 * logits) + 1.0)

    # s tile is reused (loaded once, f32) for the gating multiply.
    o_ref[0] = att * s


# ----------------------------- wrapper -----------------------------

def attention_gate_apply(params, g_nchw, s_nchw, *, tile_m=2048):
    """Fused attention gate. g_nchw: (N, Cg, H, W); s_nchw: (N, Cs, H, W)."""
    N, Cg, H, W = g_nchw.shape
    Ns, Cs, Hs, Ws_ = s_nchw.shape
    Ci = params["wo"].shape[1]
    assert (Ns, Hs, Ws_) == (N, H, W)
    assert Ci == Cs, "module's `out * s` requires out_c == in_c[1]"

    HW = H * W
    # NCHW is already channel-major; folding spatial dims is a free reshape.
    g = g_nchw.reshape(N, Cg, HW)
    s = s_nchw.reshape(N, Cs, HW)

    # Fold BN scale (diag output scaling) into the conv weights; transpose to
    # (Ci, Cin) for channel-major matmuls. Weights are tiny -> free.
    w1g = (params["wg"] * params["sg"][None, :]).T.astype(jnp.bfloat16)   # (Ci, Cg)
    w1s = (params["ws"] * params["ss"][None, :]).T.astype(jnp.bfloat16)   # (Ci, Cs)
    b1 = (params["bg"] + params["bs"]).reshape(Ci, 1).astype(jnp.float32)
    w2 = params["wo"].T.astype(jnp.bfloat16)                              # (Ci, Ci)
    b2 = params["bo"].reshape(Ci, 1).astype(jnp.float32)

    # Lane tile over the folded spatial dim: multiple of 128, or the full
    # extent. A ragged last block is masked by Pallas on store.
    if HW <= tile_m:
        tm = HW
    else:
        tm = max(128, (tile_m // 128) * 128)
    num_m = pl.cdiv(HW, tm)

    flops = 2 * N * HW * (Ci * Cg + Ci * Cs + Ci * Ci)
    bytes_accessed = (4 * N * HW * (Cg + 2 * Cs)
                      + 2 * (Ci * Cg + Ci * Cs + Ci * Ci) + 8 * Ci)
    cost = pl.CostEstimate(flops=flops, transcendentals=N * HW * Ci,
                           bytes_accessed=bytes_accessed)

    out = pl.pallas_call(
        _attn_gate_kernel,
        out_shape=jax.ShapeDtypeStruct((N, Cs, HW), jnp.float32),
        grid=(N, num_m),
        in_specs=[
            pl.BlockSpec((1, Cg, tm), lambda n, m: (n, 0, m)),
            pl.BlockSpec((1, Cs, tm), lambda n, m: (n, 0, m)),
            pl.BlockSpec((Ci, Cg), lambda n, m: (0, 0)),
            pl.BlockSpec((Ci, Cs), lambda n, m: (0, 0)),
            pl.BlockSpec((Ci, 1), lambda n, m: (0, 0)),
            pl.BlockSpec((Ci, Ci), lambda n, m: (0, 0)),
            pl.BlockSpec((Ci, 1), lambda n, m: (0, 0)),
        ],
        out_specs=pl.BlockSpec((1, Cs, tm), lambda n, m: (n, 0, m)),
        compiler_params=pltpu.CompilerParams(
            dimension_semantics=("parallel", "parallel")),
        cost_estimate=cost,
    )(g, s, w1g, w1s, b1, w2, b2)

    return out.reshape(N, Cs, H, W)


# ----------------------------- parameters -----------------------------

def _init_conv1x1(key, cin, cout):
    kw, kb = jax.random.split(key)
    w = jax.random.normal(kw, (cin, cout), jnp.float32) / np.sqrt(cin)
    b = 0.01 * jax.random.normal(kb, (cout,), jnp.float32)
    return w, b


def _fold_bn(conv_bias, cout):
    # BatchNorm2d in eval mode with default running stats / affine params.
    gamma = jnp.ones((cout,), jnp.float32)
    beta = jnp.zeros((cout,), jnp.float32)
    mean = jnp.zeros((cout,), jnp.float32)
    var = jnp.ones((cout,), jnp.float32)
    scale = gamma / jnp.sqrt(var + BN_EPS)
    bias = (conv_bias - mean) * scale + beta
    return scale, bias


def init_attention_gate(key, in_c, out_c):
    cg, cs = in_c
    kg, ks, ko = jax.random.split(key, 3)
    wg, bg = _init_conv1x1(kg, cg, out_c)
    sg, bgf = _fold_bn(bg, out_c)
    ws, bs = _init_conv1x1(ks, cs, out_c)
    ss, bsf = _fold_bn(bs, out_c)
    wo, bo = _init_conv1x1(ko, out_c, out_c)
    return dict(wg=wg, sg=sg, bg=bgf,
                ws=ws, ss=ss, bs=bsf,
                wo=wo, bo=bo)


# ----------------------------- pure-JAX reference -----------------------------

def attention_gate_reference(params, g_nchw, s_nchw):
    g = jnp.transpose(g_nchw, (0, 2, 3, 1))
    s = jnp.transpose(s_nchw, (0, 2, 3, 1))
    hg = jnp.einsum("nhwc,cd->nhwd", g, params["wg"]) * params["sg"] + params["bg"]
    hs = jnp.einsum("nhwc,cd->nhwd", s, params["ws"]) * params["ss"] + params["bs"]
    h = jnp.maximum(hg + hs, 0.0)
    logits = jnp.einsum("nhwc,cd->nhwd", h, params["wo"]) + params["bo"]
    out = jax.nn.sigmoid(logits) * s
    return jnp.transpose(out, (0, 3, 1, 2))


# ----------------------------- main -----------------------------

if __name__ == "__main__":
    key = jax.random.PRNGKey(0)
    kp, kg, ks = jax.random.split(key, 3)

    in_c, out_c = (64, 32), 32          # out_c == in_c[1], as the module requires
    N, H, W = 2, 16, 16

    params = init_attention_gate(kp, in_c, out_c)
    g = jax.random.normal(kg, (N, in_c[0], H, W), jnp.float32)
    s = jax.random.normal(ks, (N, in_c[1], H, W), jnp.float32)

    apply_fn = jax.jit(attention_gate_apply)
    out = jax.block_until_ready(apply_fn(params, g, s))

    assert out.shape == (N, in_c[1], H, W) and out.dtype == jnp.float32
    assert bool(jnp.all(jnp.isfinite(out)))

    # Numerical check vs. a pure-JAX f32 reference. Kernel matmuls use bf16
    # operands with f32 accumulation; sigmoid is exact (tanh form).
    ref = attention_gate_reference(params, g, s)
    err = float(jnp.max(jnp.abs(out - ref)))
    assert err < 5e-2, f"max |diff| vs reference = {err}"

    print("KERNEL_OK")
</pallas_src>

<mosaic_0001>
module attributes {stable_mosaic.version = 11 : i64} {
  func.func @_attn_gate_kernel(%arg0: i32, %arg1: i32, %arg2: memref<1x64x256xf32, #tpu.memory_space<vmem>>, %arg3: memref<1x32x256xf32, #tpu.memory_space<vmem>>, %arg4: memref<32x64xbf16, #tpu.memory_space<vmem>>, %arg5: memref<32x32xbf16, #tpu.memory_space<vmem>>, %arg6: memref<32x1xf32, #tpu.memory_space<vmem>>, %arg7: memref<32x32xbf16, #tpu.memory_space<vmem>>, %arg8: memref<32x1xf32, #tpu.memory_space<vmem>>, %arg9: memref<1x32x256xf32, #tpu.memory_space<vmem>>) attributes {dimension_semantics = [#tpu.dimension_semantics<parallel>, #tpu.dimension_semantics<parallel>], iteration_bounds = array<i64: 2, 1>, scalar_prefetch = 0 : i64, scratch_operands = 0 : i64, tpu.core_type = #tpu.core_type<tc>, window_params = [{transform_indices = @transform_0, window_bounds = array<i64: 1, 64, 256>}, {transform_indices = @transform_1, window_bounds = array<i64: 1, 32, 256>}, {pipeline_mode = #tpu.pipeline_mode<synchronous>, transform_indices = @transform_2, window_bounds = array<i64: 32, 64>}, {pipeline_mode = #tpu.pipeline_mode<synchronous>, transform_indices = @transform_3, window_bounds = array<i64: 32, 32>}, {pipeline_mode = #tpu.pipeline_mode<synchronous>, transform_indices = @transform_4, window_bounds = array<i64: 32, 1>}, {pipeline_mode = #tpu.pipeline_mode<synchronous>, transform_indices = @transform_5, window_bounds = array<i64: 32, 32>}, {pipeline_mode = #tpu.pipeline_mode<synchronous>, transform_indices = @transform_6, window_bounds = array<i64: 32, 1>}, {transform_indices = @transform_7, window_bounds = array<i64: 1, 32, 256>}]} {
    %c0 = arith.constant 0 : index
    %c0_0 = arith.constant 0 : index
    %c0_1 = arith.constant 0 : index
    %0 = vector.load %arg2[%c0, %c0_0, %c0_1] : memref<1x64x256xf32, #tpu.memory_space<vmem>>, vector<1x64x256xf32>
    %1 = vector.shape_cast %0 : vector<1x64x256xf32> to vector<64x256xf32>
    %c0_2 = arith.constant 0 : index
    %c0_3 = arith.constant 0 : index
    %c0_4 = arith.constant 0 : index
    %2 = vector.load %arg3[%c0_2, %c0_3, %c0_4] : memref<1x32x256xf32, #tpu.memory_space<vmem>>, vector<1x32x256xf32>
    %3 = vector.shape_cast %2 : vector<1x32x256xf32> to vector<32x256xf32>
    %c0_5 = arith.constant 0 : index
    %c0_6 = arith.constant 0 : index
    %4 = vector.load %arg4[%c0_5, %c0_6] : memref<32x64xbf16, #tpu.memory_space<vmem>>, vector<32x64xbf16>
    %5 = arith.truncf %1 : vector<64x256xf32> to vector<64x256xbf16>
    %cst = arith.constant dense<0.000000e+00> : vector<32x256xf32>
    %6 = tpu.matmul %4, %5, %cst {dimension_numbers = #tpu.dot_dimension_numbers<[1], [0], [0], [1], [0, 0, 1, 1], [], []>} : vector<32x64xbf16>, vector<64x256xbf16>, vector<32x256xf32> -> vector<32x256xf32>
    %c0_7 = arith.constant 0 : index
    %c0_8 = arith.constant 0 : index
    %7 = vector.load %arg5[%c0_7, %c0_8] : memref<32x32xbf16, #tpu.memory_space<vmem>>, vector<32x32xbf16>
    %8 = arith.truncf %3 : vector<32x256xf32> to vector<32x256xbf16>
    %cst_9 = arith.constant dense<0.000000e+00> : vector<32x256xf32>
    %9 = tpu.matmul %7, %8, %cst_9 {dimension_numbers = #tpu.dot_dimension_numbers<[1], [0], [0], [1], [0, 0, 1, 1], [], []>} : vector<32x32xbf16>, vector<32x256xbf16>, vector<32x256xf32> -> vector<32x256xf32>
    %10 = arith.addf %6, %9 : vector<32x256xf32>
    %c0_10 = arith.constant 0 : index
    %c0_11 = arith.constant 0 : index
    %11 = vector.load %arg6[%c0_10, %c0_11] : memref<32x1xf32, #tpu.memory_space<vmem>>, vector<32x1xf32>
    %12 = vector.broadcast %11 : vector<32x1xf32> to vector<32x256xf32>
    %13 = arith.addf %10, %12 : vector<32x256xf32>
    %cst_12 = arith.constant 0.000000e+00 : f32
    %14 = vector.broadcast %cst_12 : f32 to vector<32x256xf32>
    %15 = arith.maximumf %13, %14 : vector<32x256xf32>
    %c0_13 = arith.constant 0 : index
    %c0_14 = arith.constant 0 : index
    %16 = vector.load %arg7[%c0_13, %c0_14] : memref<32x32xbf16, #tpu.memory_space<vmem>>, vector<32x32xbf16>
    %17 = arith.truncf %15 : vector<32x256xf32> to vector<32x256xbf16>
    %cst_15 = arith.constant dense<0.000000e+00> : vector<32x256xf32>
    %18 = tpu.matmul %16, %17, %cst_15 {dimension_numbers = #tpu.dot_dimension_numbers<[1], [0], [0], [1], [0, 0, 1, 1], [], []>} : vector<32x32xbf16>, vector<32x256xbf16>, vector<32x256xf32> -> vector<32x256xf32>
    %c0_16 = arith.constant 0 : index
    %c0_17 = arith.constant 0 : index
    %19 = vector.load %arg8[%c0_16, %c0_17] : memref<32x1xf32, #tpu.memory_space<vmem>>, vector<32x1xf32>
    %20 = vector.broadcast %19 : vector<32x1xf32> to vector<32x256xf32>
    %21 = arith.addf %18, %20 : vector<32x256xf32>
    %cst_18 = arith.constant 5.000000e-01 : f32
    %22 = vector.broadcast %cst_18 : f32 to vector<32x256xf32>
    %23 = arith.mulf %22, %21 : vector<32x256xf32>
    %24 = math.tanh %23 : vector<32x256xf32>
    %cst_19 = arith.constant 1.000000e+00 : f32
    %25 = vector.broadcast %cst_19 : f32 to vector<32x256xf32>
    %26 = arith.addf %24, %25 : vector<32x256xf32>
    %cst_20 = arith.constant 5.000000e-01 : f32
    %27 = vector.broadcast %cst_20 : f32 to vector<32x256xf32>
    %28 = arith.mulf %27, %26 : vector<32x256xf32>
    %29 = arith.mulf %28, %3 : vector<32x256xf32>
    %c0_21 = arith.constant 0 : index
    %c0_22 = arith.constant 0 : index
    %c0_23 = arith.constant 0 : index
    %30 = vector.load %arg9[%c0_21, %c0_22, %c0_23] : memref<1x32x256xf32, #tpu.memory_space<vmem>>, vector<1x32x256xf32>
    %31 = vector.shape_cast %30 : vector<1x32x256xf32> to vector<32x256xf32>
    %32 = vector.shape_cast %29 : vector<32x256xf32> to vector<1x32x256xf32>
    tpu.vector_store %arg9[%c0_21, %c0_22, %c0_23], %32 {strides = array<i32>} : memref<1x32x256xf32, #tpu.memory_space<vmem>>, vector<1x32x256xf32>,
    return
  }
  func.func @transform_0(%arg0: i32, %arg1: i32) -> (i32, i32, i32) {
    %c0_i32 = arith.constant 0 : i32
    %c0_i32_0 = arith.constant 0 : i32
    return %arg0, %c0_i32, %arg1 : i32, i32, i32
  }
  func.func @transform_1(%arg0: i32, %arg1: i32) -> (i32, i32, i32) {
    %c0_i32 = arith.constant 0 : i32
    %c0_i32_0 = arith.constant 0 : i32
    return %arg0, %c0_i32, %arg1 : i32, i32, i32
  }
  func.func @transform_2(%arg0: i32, %arg1: i32) -> (i32, i32) {
    %c0_i32 = arith.constant 0 : i32
    %c0_i32_0 = arith.constant 0 : i32
    %c0_i32_1 = arith.constant 0 : i32
    return %c0_i32, %c0_i32_0 : i32, i32
  }
  func.func @transform_3(%arg0: i32, %arg1: i32) -> (i32, i32) {
    %c0_i32 = arith.constant 0 : i32
    %c0_i32_0 = arith.constant 0 : i32
    %c0_i32_1 = arith.constant 0 : i32
    return %c0_i32, %c0_i32_0 : i32, i32
  }
  func.func @transform_4(%arg0: i32, %arg1: i32) -> (i32, i32) {
    %c0_i32 = arith.constant 0 : i32
    %c0_i32_0 = arith.constant 0 : i32
    %c0_i32_1 = arith.constant 0 : i32
    return %c0_i32, %c0_i32_0 : i32, i32
  }
  func.func @transform_5(%arg0: i32, %arg1: i32) -> (i32, i32) {
    %c0_i32 = arith.constant 0 : i32
    %c0_i32_0 = arith.constant 0 : i32
    %c0_i32_1 = arith.constant 0 : i32
    return %c0_i32, %c0_i32_0 : i32, i32
  }
  func.func @transform_6(%arg0: i32, %arg1: i32) -> (i32, i32) {
    %c0_i32 = arith.constant 0 : i32
    %c0_i32_0 = arith.constant 0 : i32
    %c0_i32_1 = arith.constant 0 : i32
    return %c0_i32, %c0_i32_0 : i32, i32
  }
  func.func @transform_7(%arg0: i32, %arg1: i32) -> (i32, i32, i32) {
    %c0_i32 = arith.constant 0 : i32
    %c0_i32_0 = arith.constant 0 : i32
    return %arg0, %c0_i32, %arg1 : i32, i32, i32
  }
}

</mosaic_0001>

<bundles_post_ra>
// kernel: attention_gate_apply.1
= control target key start
LH: loop header
LB: loop body
LE: loop exit
PB: predicated region body
PF: predicated region fallthrough
CT: control target
= control target key end

     0   :  { %s983_s24 = smov 0   ;;  %s985_s25 = smov 0   ;;  %s1141_s0 = inlined_call_operand.vmem [shape: f32[2,64,256], index: 0, kind: input, shape index: {}]   ;;  %s1142_s1 = inlined_call_operand.vmem [shape: f32[2,32,256], index: 1, kind: input, shape index: {}]   ;;  %s1143_s2 = inlined_call_operand.vmem [shape: bf16[32,64], index: 2, kind: input, shape index: {}]   ;;  %s1144_s3 = inlined_call_operand.vmem [shape: bf16[32,32], index: 3, kind: input, shape index: {}]   ;;  %s1145_s4 = inlined_call_operand.vmem [shape: f32[32,1], index: 4, kind: input, shape index: {}]   ;;  %s1146_s5 = inlined_call_operand.vmem [shape: bf16[32,32], index: 5, kind: input, shape index: {}]   ;;  %s1147_s6 = inlined_call_operand.vmem [shape: f32[32,1], index: 6, kind: input, shape index: {}]   ;;  %s1148_s7 = inlined_call_operand.vmem [shape: f32[2,32,256], index: 7, kind: output, shape index: {}]  }
   0x1   :  { %s987_s26 = smov 0  }
   0x2 LB: > { %s29_s27 = sadd.s32 1, %s936_s25  ;;  %p837_p0 = scmp.ge.s32.totalorder %s940_s26, 1  ;;  %s940_s26 = sphi %s987_s26, %s17_s26   ;;  %s936_s25 = sphi %s985_s25, %s1150_s25   ;;  %s932_s24 = sphi %s983_s24, %s1149_s24  }
   0x3   : > { %p31_p1 = scmp.ge.s32.totalorder %s29_s27, 2  ;;  %p275_p2 = scmp.lt.s32.totalorder %s940_s26, 3 }
   0x5   : > { %s1152_s27 = smov (%p31_p1, %s29_s27), 0  ;;  %p276_p3 = pnand %p837_p0, %p275_p2 }
   0x6   : > { %p325_p4 = scmp.lt.s32.totalorder (!%p276_p3), %s932_s24, 1  ;;  %v942_v0 = vmov (!%p276_p3), 0   ;;  %v539_v1 = vld [vmem:[%s1145_s4] sm:$0xff] (!%p276_p3)  ;;  %v541_v2 = vld [vmem:[%s1145_s4 + $0x10] sm:$0xff] (!%p276_p3)  ;;  %v540_v3 = vld [vmem:[%s1145_s4 + $0x8] sm:$0xff] (!%p276_p3)  ;;  %vm409_vm0 = vcmask (!%p276_p3), 261120  }
   0x7   : > { %279 = sbr.rel (%p276_p3) target bundleno = 522 (0x20a), region = 48  ;;  %448 = vmatprep.mubr.bf16.mxu0 (!%p276_p3), %v942_v0  ;;  %894 = vset.pattern.permute.xlu0 (!%p276_p3), %v942_v0  ;;  %v542_v4 = vld [vmem:[%s1145_s4 + $0x18] sm:$0xff] (!%p276_p3)  ;;  %v587_v19 = vld [vmem:[%s1147_s6] sm:$0xff] (!%p276_p3)  ;;  %v588_v30 = vld [vmem:[%s1147_s6 + $0x8] sm:$0xff] (!%p276_p3)  ;;  %vm479_vm1 = vcmask (!%p276_p3), 523264  }
   0x8   : > { %895 = vset.pattern.permute.xlu1 (!%p276_p3), %v942_v0  ;;  %659 = vmatprep.mubr.bf16.mxu1 (!%p276_p3), %v942_v0  ;;  %v896_v25 = vld [vmem:[%s1144_s3] sm:$0xff] (!%p276_p3)   ;;  %v589_v31 = vld [vmem:[%s1147_s6 + $0x10] sm:$0xff] (!%p276_p3)  ;;  %v590_v34 = vld [vmem:[%s1147_s6 + $0x18] sm:$0xff] (!%p276_p3) }
   0x9   : > { %545 = vperm.xlu0 (!%p276_p3), %894, %v539_v1   ;;  %555 = vperm.xlu1 (!%p276_p3), %895, %v541_v2   ;;  %v897_v41 = vld [vmem:[%s1144_s3 + $0x8] sm:$0xff] (!%p276_p3)   ;;  %v898_v47 = vld [vmem:[%s1143_s2] sm:$0xff] (!%p276_p3)  }
   0xa   : > { %v899_v48 = vld [vmem:[%s1143_s2 + $0x8] sm:$0xff] (!%p276_p3)  }
   0xd   : > { %550 = vperm.xlu0 (!%p276_p3), %894, %v540_v3   ;;  %560 = vperm.xlu1 (!%p276_p3), %895, %v542_v4  }
   0xe   : > { %s1154_s24 = smov (!%p325_p4, %s932_s24), 1 }
   0xf   : > { %s858_s28 = sshll.u32 %s1154_s24, 7  ;;  %s859_s29 = sshll.u32 %s1154_s24, 6 }
  0x10   : > { %s1018_s13 = scalar_lea.vmem %s1141_s0, %s858_s28  ;;  %s342_s16 = scalar_lea.vmem %s1142_s1, %s859_s29 }
  0x11   : > { %v1031_v5 = vld [vmem:[%s342_s16 + $0x8] sm:$0xff]  ;;  %v1033_v6 = vld [vmem:[%s342_s16 + $0x18] sm:$0xff]  ;;  %v1035_v7 = vld [vmem:[%s342_s16] sm:$0xff]  ;;  %593 = vperm.xlu0 %894, %v587_v19   ;;  %598 = vperm.xlu1 %895, %v588_v30   ;;  %s1114_s30 = scalar_lea.vmem %s1148_s7, %s859_s29 }
  0x12   : > { %v396_v8 = vpack.c.bf16 %v1033_v6, %v1031_v5  ;;  %v1039_v9 = vld [vmem:[%s342_s16 + $0x10] sm:$0xff]  ;;  %v1041_v10 = vld [vmem:[%s342_s16 + $0x28] sm:$0xff]  ;;  %v1043_v11 = vld [vmem:[%s342_s16 + $0x38] sm:$0xff] }
  0x13   : > { %v395_v12 = vpack.c.bf16 %v1039_v9, %v1035_v7  ;;  %v398_v13 = vpack.c.bf16 %v1043_v11, %v1041_v10  ;;  %v1049_v14 = vld [vmem:[%s342_s16 + $0x20] sm:$0xff]  ;;  %v1051_v15 = vld [vmem:[%s342_s16 + $0x30] sm:$0xff]  ;;  %v356_v16 = vld [vmem:[%s1018_s13 + $0x8] sm:$0xff] }
  0x14   : > { %416 = vmatprep.subr.bf16.mxu0 %v396_v8  ;;  %v358_v17 = vld [vmem:[%s1018_s13 + $0x18] sm:$0xff]  ;;  %v397_v18 = vpack.c.bf16 %v1051_v15, %v1049_v14  ;;  %v355_v21 = vld [vmem:[%s1018_s13] sm:$0xff]  ;;  %v357_v22 = vld [vmem:[%s1018_s13 + $0x10] sm:$0xff] }
  0x15   : > { %417 = vmatpush1.bf16.msra.mxu0 %v395_v12  ;;  %v384_v20 = vpack.c.bf16 %v358_v17, %v356_v16  ;;  %v360_v23 = vld [vmem:[%s1018_s13 + $0x28] sm:$0xff]  ;;  %v362_v24 = vld [vmem:[%s1018_s13 + $0x38] sm:$0xff]  ;;  %v359_v26 = vld [vmem:[%s1018_s13 + $0x20] sm:$0xff]  ;;  %v383_v28 = vpack.c.bf16 %v357_v22, %v355_v21  ;;  %603 = vperm.xlu0 %894, %v589_v31  }
  0x16   : > { %418 = vmatprep.subr.bf16.mxu0 %v398_v13  ;;  %v361_v27 = vld [vmem:[%s1018_s13 + $0x30] sm:$0xff]  ;;  %v364_v29 = vld [vmem:[%s1018_s13 + $0x48] sm:$0xff]  ;;  %v386_v32 = vpack.c.bf16 %v362_v24, %v360_v23  ;;  %v366_v33 = vld [vmem:[%s1018_s13 + $0x58] sm:$0xff]  ;;  %608 = vperm.xlu1 %895, %v590_v34  }
  0x17   : > { %v385_v35 = vpack.c.bf16 %v361_v27, %v359_v26  ;;  %v388_v36 = vpack.c.bf16 %v366_v33, %v364_v29  ;;  %v363_v37 = vld [vmem:[%s1018_s13 + $0x40] sm:$0xff]  ;;  %v365_v38 = vld [vmem:[%s1018_s13 + $0x50] sm:$0xff]  ;;  %v368_v39 = vld [vmem:[%s1018_s13 + $0x68] sm:$0xff] }
  0x18   : > { %v370_v40 = vld [vmem:[%s1018_s13 + $0x78] sm:$0xff]  ;;  %v387_v42 = vpack.c.bf16 %v365_v38, %v363_v37  ;;  %v367_v44 = vld [vmem:[%s1018_s13 + $0x60] sm:$0xff]  ;;  %v369_v45 = vld [vmem:[%s1018_s13 + $0x70] sm:$0xff] }
  0x19   : > { %419 = vmatpush1.bf16.msra.mxu0 %v397_v18  ;;  %v390_v43 = vpack.c.bf16 %v370_v40, %v368_v39  ;;  %v389_v46 = vpack.c.bf16 %v369_v45, %v367_v44  ;;  %v900_v26 = vld [vmem:[%s1146_s5] sm:$0xff]   ;;  %v901_v27 = vld [vmem:[%s1146_s5 + $0x8] sm:$0xff]  }
  0x1a   : > { %486 = vmatprep.subr.bf16.mxu0 %v384_v20 }
  0x1c   : > { %846 = vmatmul.mubr.msk.bf16.vlgmr.msra.gmra.mrb[0].mxu0 %vm409_vm0, %v896_v25 }
  0x1d   : > { %487 = vmatpush1.bf16.msra.mxu0 %v383_v28  ;;  %458 = vmatprep.mubr.bf16.mxu0 %v942_v0 }
  0x1e   : > { %488 = vmatprep.subr.bf16.mxu0 %v386_v32 }
  0x21   : > { %489 = vmatpush1.bf16.msra.mxu0 %v385_v35 }
  0x22   : > { %490 = vmatprep.subr.bf16.mxu0 %v388_v36 }
  0x24   : > { %847 = vmatmul.mubr.msk.bf16.gmra.mrb[4].mxu0 %vm409_vm0, %v897_v41 }
  0x25   : > { %491 = vmatpush1.bf16.msra.mxu0 %v387_v42  ;;  %518 = vmatprep.mubr.bf16.mxu0 %v942_v0 }
  0x26   : > { %492 = vmatprep.subr.bf16.mxu0 %v390_v43 }
  0x29   : > { %493 = vmatpush1.bf16.msra.mxu0 %v389_v46 }
  0x2c   : > { %850 = vmatmul.mubr.msk.bf16.vlgmr.msra.gmra.mrb[0].mxu0 %vm479_vm1, %v898_v47 }
  0x2d   : > { %528 = vmatprep.mubr.bf16.mxu0 %v942_v0 }
  0x34   : > { %851 = vmatmul.mubr.msk.bf16.gmra.mrb[4].mxu0 %vm479_vm1, %v899_v48 }
  0x88   : > { %v546_v49 = vpop.permute.xlu0 %545  ;;  %v556_v58 = vpop.permute.xlu1 %555 }
  0x8c   : > { %v551_v53 = vpop.permute.xlu0 %550  ;;  %v561_v12 = vpop.permute.xlu1 %560 }
  0x90   : > { %v594_v28 = vpop.permute.xlu0 %593  ;;  %v599_v32 = vpop.permute.xlu1 %598 }
  0x94   : > { %v604_v41 = vpop.permute.xlu0 %603 }
  0x95   : > { %v609_v45 = vpop.permute.xlu1 %608 }
  0xff   : > { %v520_v50 = vpop.f32.mrb[0].mxu0 }
 0x100   : > { %v563_v51 = vadd.f32 %v546_v49, %v520_v50  ;;  %v522_v52 = vpop.f32.mrb[1].mxu0 }
 0x101   : > { %v564_v54 = vadd.f32 %v546_v49, %v522_v52  ;;  %v524_v55 = vpop.f32.mrb[2].mxu0 }
 0x102   : > { %v565_v56 = vadd.f32 %v551_v53, %v524_v55  ;;  %v526_v57 = vpop.f32.mrb[3].mxu0  ;;  %v571_v60 = vmax.f32 %v563_v51, 0.0 }
 0x103   : > { %v566_v59 = vadd.f32 %v551_v53, %v526_v57  ;;  %v572_v62 = vmax.f32 %v564_v54, 0.0 }
 0x104   : > { %v573_v61 = vmax.f32 %v565_v56, 0.0 }
 0x105   : > { %v574_v63 = vmax.f32 %v566_v59, 0.0 }
 0x106   : > { %v583_v1 = vpack.c.bf16 %v573_v61, %v571_v60 }
 0x107   : > { %v530_v2 = vpop.f32.mrb[4].mxu0  ;;  %v584_v3 = vpack.c.bf16 %v574_v63, %v572_v62 }
 0x108   : > { %v567_v4 = vadd.f32 %v556_v58, %v530_v2  ;;  %v532_v8 = vpop.f32.mrb[5].mxu0 }
 0x109   : > { %v568_v13 = vadd.f32 %v556_v58, %v532_v8  ;;  %v534_v16 = vpop.f32.mrb[6].mxu0  ;;  %627 = vmatprep.subr.bf16.mxu1 %v584_v3 }
 0x10a   : > { %v569_v17 = vadd.f32 %v561_v12, %v534_v16  ;;  %v536_v18 = vpop.f32.mrb[7].mxu0  ;;  %628 = vmatpush1.bf16.msra.mxu1 %v583_v1  ;;  %v575_v20 = vmax.f32 %v567_v4, 0.0 }
 0x10b   : > { %v570_v19 = vadd.f32 %v561_v12, %v536_v18  ;;  %v576_v22 = vmax.f32 %v568_v13, 0.0 }
 0x10c   : > { %v577_v21 = vmax.f32 %v569_v17, 0.0 }
 0x10d   : > { %v578_v23 = vmax.f32 %v570_v19, 0.0 }
 0x10e   : > { %v585_v24 = vpack.c.bf16 %v577_v21, %v575_v20 }
 0x10f   : > { %v586_v25 = vpack.c.bf16 %v578_v23, %v576_v22 }
 0x111   : > { %629 = vmatprep.subr.bf16.mxu1 %v586_v25 }
 0x112   : > { %630 = vmatpush1.bf16.msra.mxu1 %v585_v24 }
 0x115   : > { %854 = vmatmul.mubr.msk.bf16.vlgmr.msra.gmra.mrb[0].mxu1 %vm409_vm0, %v900_v26 }
 0x116   : > { %669 = vmatprep.mubr.bf16.mxu1 %v942_v0 }
 0x11d   : > { %855 = vmatmul.mubr.msk.bf16.gmra.mrb[4].mxu1 %vm409_vm0, %v901_v27 }
 0x1e8   : > { %v661_v29 = vpop.f32.mrb[0].mxu1 }
 0x1e9   : > { %v662_v30 = vadd.f32 %v661_v29, %v594_v28  ;;  %v663_v31 = vpop.f32.mrb[1].mxu1 }
 0x1ea   : > { %v664_v33 = vadd.f32 %v663_v31, %v594_v28  ;;  %v665_v34 = vpop.f32.mrb[2].mxu1 }
 0x1eb   : > { %v680_v35 = vmul.f32 0.5, %v662_v30  ;;  %v666_v36 = vadd.f32 %v665_v34, %v599_v32  ;;  %v667_v37 = vpop.f32.mrb[3].mxu1 }
 0x1ec   : > { %v681_v38 = vmul.f32 0.5, %v664_v33  ;;  %v668_v39 = vadd.f32 %v667_v37, %v599_v32 }
 0x1ed   : > { %902 = vtanh.f32 %v680_v35  ;;  %v682_v0 = vmul.f32 0.5, %v666_v36 }
 0x1ee   : > { %904 = vtanh.f32 %v681_v38  ;;  %v683_v40 = vmul.f32 0.5, %v668_v39 }
 0x1ef   : > { %906 = vtanh.f32 %v682_v0 }
 0x1f0   : > { %908 = vtanh.f32 %v683_v40  ;;  %v671_v42 = vpop.f32.mrb[4].mxu1 }
 0x1f1   : > { %v672_v43 = vadd.f32 %v671_v42, %v604_v41  ;;  %v673_v44 = vpop.f32.mrb[5].mxu1 }
 0x1f2   : > { %v674_v46 = vadd.f32 %v673_v44, %v604_v41  ;;  %v675_v47 = vpop.f32.mrb[6].mxu1 }
 0x1f3   : > { %v684_v48 = vmul.f32 0.5, %v672_v43  ;;  %v676_v49 = vadd.f32 %v675_v47, %v609_v45  ;;  %v677_v50 = vpop.f32.mrb[7].mxu1 }
 0x1f4   : > { %v685_v51 = vmul.f32 0.5, %v674_v46  ;;  %v678_v52 = vadd.f32 %v677_v50, %v609_v45 }
 0x1f5   : > { %910 = vtanh.f32 %v684_v48  ;;  %v686_v53 = vmul.f32 0.5, %v676_v49 }
 0x1f6   : > { %912 = vtanh.f32 %v685_v51  ;;  %v687_v54 = vmul.f32 0.5, %v678_v52 }
 0x1f7   : > { %v903_v55 = vpop.eup %902  ;;  %914 = vtanh.f32 %v686_v53 }
 0x1f8   : > { %v905_v56 = vpop.eup %904  ;;  %v696_v57 = vadd.f32 1.0, %v903_v55  ;;  %916 = vtanh.f32 %v687_v54 }
 0x1f9   : > { %v907_v58 = vpop.eup %906  ;;  %v697_v59 = vadd.f32 1.0, %v905_v56 }
 0x1fa   : > { %v909_v60 = vpop.eup %908  ;;  %v704_v61 = vmul.f32 0.5, %v696_v57  ;;  %v698_v62 = vadd.f32 1.0, %v907_v58 }
 0x1fb   : > { %v705_v63 = vmul.f32 0.5, %v697_v59  ;;  %v699_v1 = vadd.f32 1.0, %v909_v60 }
 0x1fc   : > { %v712_v2 = vmul.f32 %v704_v61, %v1035_v7  ;;  %v706_v3 = vmul.f32 0.5, %v698_v62 }
 0x1fd   : > { %v713_v4 = vmul.f32 %v705_v63, %v1031_v5  ;;  %v707_v8 = vmul.f32 0.5, %v699_v1 }
 0x1fe   : > { %720 = vst [vmem:[%s1114_s30] sm:$0xff] %v712_v2  ;;  %v714_v12 = vmul.f32 %v706_v3, %v1039_v9 }
 0x1ff   : > { %v911_v13 = vpop.eup %910  ;;  %721 = vst [vmem:[%s1114_s30 + $0x8] sm:$0xff] %v713_v4  ;;  %v715_v16 = vmul.f32 %v707_v8, %v1033_v6 }
 0x200   : > { %v913_v17 = vpop.eup %912  ;;  %722 = vst [vmem:[%s1114_s30 + $0x10] sm:$0xff] %v714_v12  ;;  %v700_v18 = vadd.f32 1.0, %v911_v13 }
 0x201   : > { %v915_v19 = vpop.eup %914  ;;  %723 = vst [vmem:[%s1114_s30 + $0x18] sm:$0xff] %v715_v16  ;;  %v701_v7 = vadd.f32 1.0, %v913_v17 }
 0x202   : > { %v917_v20 = vpop.eup %916  ;;  %v708_v5 = vmul.f32 0.5, %v700_v18  ;;  %v702_v21 = vadd.f32 1.0, %v915_v19 }
 0x203   : > { %v709_v22 = vmul.f32 0.5, %v701_v7  ;;  %v703_v23 = vadd.f32 1.0, %v917_v20 }
 0x204   : > { %v716_v9 = vmul.f32 %v708_v5, %v1049_v14  ;;  %v710_v24 = vmul.f32 0.5, %v702_v21 }
 0x205   : > { %v717_v6 = vmul.f32 %v709_v22, %v1041_v10  ;;  %v711_v25 = vmul.f32 0.5, %v703_v23 }
 0x206   : > { %724 = vst [vmem:[%s1114_s30 + $0x20] sm:$0xff] %v716_v9  ;;  %v718_v26 = vmul.f32 %v710_v24, %v1051_v15 }
 0x207   : > { %725 = vst [vmem:[%s1114_s30 + $0x28] sm:$0xff] %v717_v6  ;;  %v719_v27 = vmul.f32 %v711_v25, %v1043_v11 }
 0x208   : > { %726 = vst [vmem:[%s1114_s30 + $0x30] sm:$0xff] %v718_v26 }
 0x209   : > { %727 = vst [vmem:[%s1114_s30 + $0x38] sm:$0xff] %v719_v27 }
 0x20a PF: > { %s17_s26 = sadd.s32 1, %s940_s26   ;;  %s1149_s24 = smov %s936_s25 }
 0x20b   : > { %p14_p5 = scmp.ge.s32.totalorder %s17_s26, 4   ;;  %s1150_s25 = smov %s1152_s27 }
 0x20d   :  { %16 = sbr.rel (!%p14_p5) target bundleno = 2 (0x2), region = 81 }

</bundles_post_ra>
